<compile_context>
chip_gen: v5e
topology: v5e:2x2
jax: 0.10.0
libtpu: 0.0.40
codegen_flags: <defaults>
</compile_context>

<pallas_src>
import math

import jax
import jax.numpy as jnp
from jax.experimental import pallas as pl
from jax.experimental.pallas import tpu as pltpu

IN_FEATURES = 128


def _round_up(n, m):
    return ((n + m - 1) // m) * m


def _cdiv(a, b):
    return (a + b - 1) // b


def _head_kernel(x_ref, w_ref, b_ref, o_ref):
    # x_ref: (TB, 128)   w_ref: (128, C)   b_ref: (1, C)   o_ref: (TB, C)
    logits = (
        jnp.dot(x_ref[...], w_ref[...], preferred_element_type=jnp.float32)
        + b_ref[...]
    )
    # Numerically-stable softmax over the class axis; exact division (the
    # kernel is DMA-bound, so the EUP approx reciprocal buys no wall-clock).
    m = jnp.max(logits, axis=-1, keepdims=True)
    e = jnp.exp(logits - m)
    denom = jnp.sum(e, axis=-1, keepdims=True)
    o_ref[...] = (e / denom).astype(o_ref.dtype)


def _choose_block(batch, block_b, dtype):
    sub = 16 if dtype == jnp.bfloat16 else 8  # sublane packing granularity
    if batch <= sub:
        return batch  # block == full batch extent: no masking / padding at all
    if batch <= 2 * block_b:
        # Split into (at least) two blocks so both v7x TCs get a share of the
        # HBM path; keep it sublane-aligned.
        return _round_up(_cdiv(batch, 2), sub)
    return block_b


def sbp_raw_head_forward(x, w_t, b, *, block_b=2048):
    """Forward pass of SBP_raw_Head_NN (inference semantics).

    x:   (B, ...) with prod(...) == 128; consumed in its own dtype (f32/bf16).
    w_t: (128, classes) pre-transposed Linear weight.
    b:   (classes,) bias.
    Returns softmax probabilities, shape (B, classes), float32.
    """
    batch = x.shape[0]
    x2d = x.reshape(batch, -1)  # no dtype up-cast: keep HBM read narrow
    assert x2d.shape[1] == IN_FEATURES, f"expected 128 features, got {x2d.shape[1]}"
    classes = w_t.shape[1]

    # TODO(synk): Dropout(0.5) is a no-op at inference; training-mode dropout
    # (mask + 2x scale) is not implemented here.

    w = w_t.astype(x2d.dtype)  # tiny one-time cast; dt x dt -> f32 on the MXU
    b2 = b.reshape(1, classes).astype(jnp.float32)

    tb = _choose_block(batch, block_b, x2d.dtype)
    grid = (_cdiv(batch, tb),)
    itemsize = x2d.dtype.itemsize

    out = pl.pallas_call(
        _head_kernel,
        out_shape=jax.ShapeDtypeStruct((batch, classes), jnp.float32),
        grid_spec=pltpu.PrefetchScalarGridSpec(
            num_scalar_prefetch=0,
            grid=grid,
            in_specs=[
                pl.BlockSpec((tb, IN_FEATURES), lambda i: (i, 0)),
                pl.BlockSpec((IN_FEATURES, classes), lambda i: (0, 0)),
                pl.BlockSpec((1, classes), lambda i: (0, 0)),
            ],
            out_specs=pl.BlockSpec((tb, classes), lambda i: (i, 0)),
        ),
        compiler_params=pltpu.CompilerParams(
            dimension_semantics=("parallel",),
        ),
        cost_estimate=pl.CostEstimate(
            flops=2 * batch * IN_FEATURES * classes,
            transcendentals=batch * classes,
            bytes_accessed=(
                batch * IN_FEATURES * itemsize      # x read
                + batch * classes * 4               # probs write
                + IN_FEATURES * classes * itemsize  # weights (VMEM-resident)
                + classes * 4                       # bias
            ),
        ),
    )(x2d, w, b2)
    return out


def init_params(key, classes):
    """Match nn.Linear(128, classes) with xavier_uniform_ weights (as applied
    by the module) and PyTorch's default uniform bias init."""
    k_w, k_b = jax.random.split(key)
    fan_in, fan_out = IN_FEATURES, classes
    bound_w = math.sqrt(6.0 / (fan_in + fan_out))
    w = jax.random.uniform(
        k_w, (classes, IN_FEATURES), jnp.float32, minval=-bound_w, maxval=bound_w
    )
    bound_b = 1.0 / math.sqrt(fan_in)
    b = jax.random.uniform(
        k_b, (classes,), jnp.float32, minval=-bound_b, maxval=bound_b
    )
    # Pre-transpose weight so the kernel computes x @ W^T as x @ w_t.
    return w.T, b


if __name__ == "__main__":
    classes = 4
    batch = 2

    key = jax.random.PRNGKey(0)
    k_x, k_p = jax.random.split(key)

    # Input shaped like the upstream feature map; flattens to (batch, 128).
    x = jax.random.normal(k_x, (batch, 8, 16), jnp.float32)
    w_t, b = init_params(k_p, classes)

    out = jax.block_until_ready(sbp_raw_head_forward(x, w_t, b))

    # Pure-JAX reference.
    x2d = x.reshape(batch, -1)
    ref = jax.nn.softmax(x2d @ w_t + b[None, :], axis=1)

    assert out.shape == (batch, classes)
    assert bool(jnp.all(jnp.isfinite(out)))
    assert jnp.allclose(out, ref, atol=1e-3, rtol=1e-3), float(
        jnp.max(jnp.abs(out - ref))
    )
    # Exact division -> rows sum to 1 to f32 rounding.
    assert jnp.allclose(jnp.sum(out, axis=1), 1.0, atol=1e-5)

    print("KERNEL_OK")
</pallas_src>

<mosaic_0001>
module attributes {stable_mosaic.version = 11 : i64} {
  func.func @_head_kernel(%arg0: i32, %arg1: memref<2x128xf32, #tpu.memory_space<vmem>>, %arg2: memref<128x4xf32, #tpu.memory_space<vmem>>, %arg3: memref<1x4xf32, #tpu.memory_space<vmem>>, %arg4: memref<2x4xf32, #tpu.memory_space<vmem>>) attributes {dimension_semantics = [#tpu.dimension_semantics<parallel>], iteration_bounds = array<i64: 1>, scalar_prefetch = 0 : i64, scratch_operands = 0 : i64, tpu.core_type = #tpu.core_type<tc>, window_params = [{transform_indices = @transform_0, window_bounds = array<i64: 2, 128>}, {pipeline_mode = #tpu.pipeline_mode<synchronous>, transform_indices = @transform_1, window_bounds = array<i64: 128, 4>}, {pipeline_mode = #tpu.pipeline_mode<synchronous>, transform_indices = @transform_2, window_bounds = array<i64: 1, 4>}, {transform_indices = @transform_3, window_bounds = array<i64: 2, 4>}]} {
    %c0 = arith.constant 0 : index
    %c0_0 = arith.constant 0 : index
    %0 = vector.load %arg1[%c0, %c0_0] : memref<2x128xf32, #tpu.memory_space<vmem>>, vector<2x128xf32>
    %c0_1 = arith.constant 0 : index
    %c0_2 = arith.constant 0 : index
    %1 = vector.load %arg2[%c0_1, %c0_2] : memref<128x4xf32, #tpu.memory_space<vmem>>, vector<128x4xf32>
    %cst = arith.constant dense<0.000000e+00> : vector<2x4xf32>
    %2 = tpu.matmul %0, %1, %cst {dimension_numbers = #tpu.dot_dimension_numbers<[1], [0], [0], [1], [0, 0, 1, 1], [], []>} : vector<2x128xf32>, vector<128x4xf32>, vector<2x4xf32> -> vector<2x4xf32>
    %c0_3 = arith.constant 0 : index
    %c0_4 = arith.constant 0 : index
    %3 = vector.load %arg3[%c0_3, %c0_4] : memref<1x4xf32, #tpu.memory_space<vmem>>, vector<1x4xf32>
    %4 = vector.broadcast %3 : vector<1x4xf32> to vector<2x4xf32>
    %5 = arith.addf %2, %4 : vector<2x4xf32>
    %cst_5 = arith.constant dense<0xFF800000> : vector<2xf32>
    %6 = vector.multi_reduction <maximumf>, %5, %cst_5 [1] : vector<2x4xf32> to vector<2xf32>
    %7 = vector.shape_cast %6 : vector<2xf32> to vector<2x1xf32>
    %8 = vector.broadcast %7 : vector<2x1xf32> to vector<2x4xf32>
    %9 = arith.subf %5, %8 : vector<2x4xf32>
    %10 = math.exp %9 : vector<2x4xf32>
    %cst_6 = arith.constant dense<0.000000e+00> : vector<2xf32>
    %11 = vector.multi_reduction <add>, %10, %cst_6 [1] : vector<2x4xf32> to vector<2xf32>
    %12 = vector.shape_cast %11 : vector<2xf32> to vector<2x1xf32>
    %13 = vector.broadcast %12 : vector<2x1xf32> to vector<2x4xf32>
    %14 = arith.divf %10, %13 : vector<2x4xf32>
    %c0_7 = arith.constant 0 : index
    %c0_8 = arith.constant 0 : index
    %15 = vector.load %arg4[%c0_7, %c0_8] : memref<2x4xf32, #tpu.memory_space<vmem>>, vector<2x4xf32>
    tpu.vector_store %arg4[%c0_7, %c0_8], %14 {strides = array<i32>} : memref<2x4xf32, #tpu.memory_space<vmem>>, vector<2x4xf32>,
    return
  }
  func.func @transform_0(%arg0: i32) -> (i32, i32) {
    %c0_i32 = arith.constant 0 : i32
    %c0_i32_0 = arith.constant 0 : i32
    return %arg0, %c0_i32 : i32, i32
  }
  func.func @transform_1(%arg0: i32) -> (i32, i32) {
    %c0_i32 = arith.constant 0 : i32
    %c0_i32_0 = arith.constant 0 : i32
    %c0_i32_1 = arith.constant 0 : i32
    return %c0_i32, %c0_i32_0 : i32, i32
  }
  func.func @transform_2(%arg0: i32) -> (i32, i32) {
    %c0_i32 = arith.constant 0 : i32
    %c0_i32_0 = arith.constant 0 : i32
    %c0_i32_1 = arith.constant 0 : i32
    return %c0_i32, %c0_i32_0 : i32, i32
  }
  func.func @transform_3(%arg0: i32) -> (i32, i32) {
    %c0_i32 = arith.constant 0 : i32
    %c0_i32_0 = arith.constant 0 : i32
    return %arg0, %c0_i32 : i32, i32
  }
}

</mosaic_0001>

<bundles_post_ra>
// kernel: tpu_custom_call.1
= control target key start
LH: loop header
LB: loop body
LE: loop exit
PB: predicated region body
PF: predicated region fallthrough
CT: control target
= control target key end

     0   :  { %s211_s0 = inlined_call_operand.vmem [shape: f32[2,128], index: 0, kind: input, shape index: {}]   ;;  %s212_s1 = inlined_call_operand.vmem [shape: f32[128,4], index: 1, kind: input, shape index: {}]   ;;  %s213_s2 = inlined_call_operand.vmem [shape: f32[1,4], index: 2, kind: input, shape index: {}]   ;;  %s214_s3 = inlined_call_operand.hbm [shape: f32[2,4], index: 3, kind: output, shape index: {}]  }
   0x1   :  { %v31_v0 = vld [vmem:[%s212_s1 + $0x78] sm:$0xff]  ;;  %v30_v1 = vld [vmem:[%s212_s1 + $0x70] sm:$0xff]  ;;  %v29_v2 = vld [vmem:[%s212_s1 + $0x68] sm:$0xff] }
   0x2   :  { %36 = vmatpush.msra.mxu0 %v31_v0  ;;  %v28_v3 = vld [vmem:[%s212_s1 + $0x60] sm:$0xff]  ;;  %v27_v4 = vld [vmem:[%s212_s1 + $0x58] sm:$0xff] }
   0x4   :  { %37 = vmatpush.msra.mxu0 %v30_v1 }
   0x6   :  { %38 = vmatpush.msra.mxu0 %v29_v2 }
   0x7   :  { %8 = vsyncpa [#allocation3], 0  ;;  %v26_v5 = vld [vmem:[%s212_s1 + $0x50] sm:$0xff]  ;;  %v25_v6 = vld [vmem:[%s212_s1 + $0x48] sm:$0xff]  ;;  %vm56_vm0 = vcmask 25600   ;;  %s89_s22 = sshll.u32 %s214_s3, 4  ;;  %s90_s22 = int_to_ptr.hbm [resolvable:$true] %s89_s22 }
   0x8   :  { %39 = vmatpush.msra.mxu0 %v28_v3  ;;  %v24_v7 = vld [vmem:[%s212_s1 + $0x40] sm:$0xff]  ;;  %v23_v8 = vld [vmem:[%s212_s1 + $0x38] sm:$0xff]  ;;  %v22_v9 = vld [vmem:[%s212_s1 + $0x30] sm:$0xff] }
   0x9   :  { %v21_v10 = vld [vmem:[%s212_s1 + $0x28] sm:$0xff]  ;;  %v20_v11 = vld [vmem:[%s212_s1 + $0x20] sm:$0xff]  ;;  %v19_v12 = vld [vmem:[%s212_s1 + $0x18] sm:$0xff] }
   0xa   :  { %40 = vmatpush.msra.mxu0 %v27_v4  ;;  %v18_v13 = vld [vmem:[%s212_s1 + $0x10] sm:$0xff]  ;;  %v17_v14 = vld [vmem:[%s212_s1 + $0x8] sm:$0xff]  ;;  %v16_v15 = vld [vmem:[%s212_s1] sm:$0xff] }
   0xb   :  { %v15_v16 = vld [vmem:[%s211_s0] sm:$0x3]  ;;  %s130_s0 = smov [#allocation2]  }
   0xc   :  { %41 = vmatpush.msra.mxu0 %v26_v5  ;;  %v99_v17 = vld [vmem:[%s213_s2] ss:$0 sm:$0xff]  ;;  %s87_s1 = sshll.u32 %s130_s0, 4  ;;  %s88_s1 = int_to_ptr.vmem [resolvable:$true] %s87_s1 }
   0xe   :  { %42 = vmatpush.msra.mxu0 %v25_v6 }
  0x10   :  { %43 = vmatpush.msra.mxu0 %v24_v7 }
  0x12   :  { %44 = vmatpush.msra.mxu0 %v23_v8 }
  0x14   :  { %45 = vmatpush.msra.mxu0 %v22_v9 }
  0x16   :  { %46 = vmatpush.msra.mxu0 %v21_v10 }
  0x18   :  { %47 = vmatpush.msra.mxu0 %v20_v11 }
  0x1a   :  { %48 = vmatpush.msra.mxu0 %v19_v12 }
  0x1c   :  { %49 = vmatpush.msra.mxu0 %v18_v13 }
  0x1e   :  { %50 = vmatpush.msra.mxu0 %v17_v14 }
  0x20   :  { %51 = vmatpush.msra.mxu0 %v16_v15 }
  0x21   :  { %52 = vmatmul.f32.vlgmr.msra.gmra.mxu0 %v15_v16 }
  0x9e   :  { %v53_v18 = vpop.f32.mrf.mxu0 }
  0x9f   :  { %v54_v19 = vadd.f32 %v99_v17, %v53_v18 }
  0xa1   :  { %v57_v20 = vsel %vm56_vm0, %v54_v19, -inf }
  0xa2   :  { %58 = vmax.xlane.f32.xlu0 %v57_v20 }
 0x115   :  { %v59_v21 = vpop.xlane.xlu0 %58 }
 0x116   :  { %v60_v22 = vsub.f32 %v54_v19, %v59_v21 }
 0x118   :  { %v61_v23 = vmul.f32 1.442695, %v60_v22 }
 0x11a   :  { %100 = vpow2.f32 %v61_v23 }
 0x120   :  { %v101_v24 = vpop.eup %100 }
 0x121   :  { %v63_v25 = vsel %vm56_vm0, %v101_v24, 0.0 }
 0x122   :  { %64 = vadd.xlane.f32.xlu0 %v63_v25 }
 0x195   :  { %v65_v26 = vpop.xlane.xlu0 %64 }
 0x196   :  { %102 = vrcp.f32 %v65_v26  ;;  %v77_v30 = vand.u32 2147483648, %v65_v26  ;;  %v75_v32 = vand.u32 2147483647, %v65_v26  ;;  %vm71_vm2 = vweird.f32 %v65_v26 }
 0x198   :  { %v78_v34 = vor.u32 1.1754944e-38, %v77_v30  ;;  %vm76_vm4 = vcmp.eq.f32.partialorder %v75_v32, 8.507059e+37 }
 0x19c   :  { %v103_v27 = vpop.eup %102 }
 0x19d   :  { %v67_v28 = vmul.f32 %v103_v27, %v65_v26  ;;  %vm72_vm1 = vweird.f32 %v103_v27 }
 0x19e   :  { %vm73_vm3 = vmor %vm71_vm2, %vm72_vm1 }
 0x19f   :  { %v68_v29 = vsub.f32 1.0, %v67_v28 }
 0x1a1   :  { %v69_v31 = vmul.f32 %v103_v27, %v68_v29 }
 0x1a3   :  { %v70_v33 = vadd.f32 %v103_v27, %v69_v31 }
 0x1a5   :  { %v74_v35 = vsel %vm73_vm3, %v103_v27, %v70_v33 }
 0x1a6   :  { %v79_v36 = vsel %vm76_vm4, %v78_v34, %v74_v35 }
 0x1a7   :  { %v80_v37 = vmul.f32 %v101_v24, %v79_v36 }
 0x1a9   :  { %81 = vst.msk [vmem:[#allocation2] sm:$0x3] %vm56_vm0, %v80_v37 }
 0x1aa   :  { %92 = dma.vmem_to_hbm [thread:$0]  %s88_s1, 32, %s90_s22, [#allocation3]  }
 0x1ab   :  { %128 = dma.done.wait [#allocation3], 32  }
 0x1ac   :  { %129 = vsyncadd [#allocation3], 4294967264 }
 0x1ad   :  { %97 = vsyncpa [#allocation3], 1 }

</bundles_post_ra>
